<compile_context>
chip_gen: v5e
topology: v5e:2x2
jax: 0.10.0
libtpu: 0.0.40
codegen_flags: <defaults>
</compile_context>

<pallas_src>
import jax
import jax.numpy as jnp
from jax.experimental import pallas as pl
from jax.experimental.pallas import tpu as pltpu


def _round_up(n, m):
    return ((n + m - 1) // m) * m


def chatbot_mlp_kernel(x_ref, w1_ref, b1_ref, w2_ref, b2_ref, o_ref):
    # x tile arrives bf16 from the wrapper (astype is a no-op then).
    xb = x_ref[...].astype(jnp.bfloat16)
    # fc1: [TB, I] @ [I, Hp] -> f32 accumulation on the MXU (bf16 operands).
    h = jnp.dot(xb, w1_ref[...], preferred_element_type=jnp.float32)
    # bias + ReLU in f32 (VPU). Dropout(p=0.5) is identity at inference.
    h = jnp.maximum(h + b1_ref[...], 0.0)
    # fc2: padded hidden columns are exactly 0 and w2's padded rows are 0, so
    # logits equal the unpadded f32-accumulated result. Output dim is the real
    # O (no padded lanes), so no masking is needed before the softmax.
    logits = jnp.dot(h.astype(jnp.bfloat16), w2_ref[...],
                     preferred_element_type=jnp.float32) + b2_ref[...]
    # Numerically stable softmax over dim=1 with EXACT normalization
    # (approx reciprocal previously broke the row-sum==1 guarantee).
    m = jnp.max(logits, axis=1, keepdims=True)
    e = jnp.exp(logits - m)
    denom = jnp.sum(e, axis=1, keepdims=True)
    o_ref[...] = (e / denom).astype(o_ref.dtype)


def prepare_params(w1, b1, w2, b2):
    """Done ONCE (not per call): pad only the hidden dim to a multiple of 128
    (lane-dense intermediates) and cast matmul operands to bf16. Input and
    output feature dims stay unpadded (full-extent block dims)."""
    I, H = w1.shape
    _, O = w2.shape
    Hp = _round_up(H, 128)
    w1p = jnp.zeros((I, Hp), jnp.float32).at[:, :H].set(w1).astype(jnp.bfloat16)
    b1p = jnp.zeros((1, Hp), jnp.float32).at[:, :H].set(b1)
    w2p = jnp.zeros((Hp, O), jnp.float32).at[:H, :].set(w2).astype(jnp.bfloat16)
    b2p = jnp.asarray(b2, jnp.float32).reshape(1, O)
    return w1p, b1p, w2p, b2p


def chatbot_model_forward(x, padded_params, *, block_b=128):
    """x: [B, input_size] f32 (or bf16); padded_params from prepare_params.
    Returns softmax probabilities [B, output_size] f32.
    block_b=128 -> grid=(2,) for batch 256 (both v7x TensorCores used);
    block_b=256 -> grid=(1,) is marginally better on single-core v5e/v6e."""
    w1p, b1p, w2p, b2p = padded_params
    I, Hp = w1p.shape
    O = w2p.shape[1]
    B = x.shape[0]
    Bp = _round_up(B, block_b)

    # bf16 input stream (halves x DMA bytes). When batch padding is needed the
    # cast fuses into the pad; otherwise it is one tiny convert op.
    if Bp == B:
        xp = x.astype(jnp.bfloat16)
    else:
        xp = jnp.zeros((Bp, I), jnp.bfloat16).at[:B, :].set(x.astype(jnp.bfloat16))

    grid = (Bp // block_b,)
    out = pl.pallas_call(
        chatbot_mlp_kernel,
        out_shape=jax.ShapeDtypeStruct((Bp, O), jnp.float32),
        grid=grid,
        in_specs=[
            # Batch tile marches over the grid; weights/biases stay resident.
            pl.BlockSpec((block_b, I), lambda i: (i, 0)),
            pl.BlockSpec((I, Hp), lambda i: (0, 0)),
            pl.BlockSpec((1, Hp), lambda i: (0, 0)),
            pl.BlockSpec((Hp, O), lambda i: (0, 0)),
            pl.BlockSpec((1, O), lambda i: (0, 0)),
        ],
        out_specs=pl.BlockSpec((block_b, O), lambda i: (i, 0)),
        compiler_params=pltpu.CompilerParams(
            dimension_semantics=("parallel",)),
    )(xp, w1p, b1p, w2p, b2p)
    # Only a row slice when the batch was padded; no column slice ever.
    return out if Bp == B else out[:B]


def init_params(key, input_size, hidden_size, output_size):
    """Deterministic init mimicking nn.Linear's U(-1/sqrt(fan_in), 1/sqrt(fan_in))."""
    k1, k2, k3, k4 = jax.random.split(key, 4)
    bound1 = 1.0 / jnp.sqrt(jnp.float32(input_size))
    bound2 = 1.0 / jnp.sqrt(jnp.float32(hidden_size))
    w1 = jax.random.uniform(k1, (input_size, hidden_size), jnp.float32, -bound1, bound1)
    b1 = jax.random.uniform(k2, (1, hidden_size), jnp.float32, -bound1, bound1)
    w2 = jax.random.uniform(k3, (hidden_size, output_size), jnp.float32, -bound2, bound2)
    b2 = jax.random.uniform(k4, (1, output_size), jnp.float32, -bound2, bound2)
    return w1, b1, w2, b2


if __name__ == "__main__":
    batch = 256          # amortizes launch/DMA overhead; Bp == B (no pad/slice)
    input_size = 32
    hidden_size = 64
    output_size = 16

    key = jax.random.PRNGKey(0)
    kx, kp = jax.random.split(key)
    x = jax.random.normal(kx, (batch, input_size), jnp.float32)
    w1, b1, w2, b2 = init_params(kp, input_size, hidden_size, output_size)

    padded_params = prepare_params(w1, b1, w2, b2)
    out = chatbot_model_forward(x, padded_params, block_b=128)
    out = jax.block_until_ready(out)
    assert out.shape == (batch, output_size)

    # Reference 1: same math as the kernel (bf16 matmul operands, f32 accum).
    xb = x.astype(jnp.bfloat16)
    h_b = jnp.maximum(
        jnp.dot(xb, w1.astype(jnp.bfloat16),
                preferred_element_type=jnp.float32) + b1, 0.0)
    logits_b = jnp.dot(h_b.astype(jnp.bfloat16), w2.astype(jnp.bfloat16),
                       preferred_element_type=jnp.float32) + b2
    ref_bf16 = jax.nn.softmax(logits_b, axis=1)
    assert jnp.allclose(out, ref_bf16, atol=5e-3, rtol=5e-3)

    # Reference 2: pure f32 PyTorch-equivalent math (looser tol: bf16 MXU inputs).
    ref_f32 = jax.nn.softmax(jnp.maximum(x @ w1 + b1, 0.0) @ w2 + b2, axis=1)
    assert jnp.allclose(out, ref_f32, atol=5e-2, rtol=5e-2)

    # Exact normalization: softmax rows sum to 1 up to f32 rounding.
    assert jnp.allclose(jnp.sum(out, axis=1), 1.0, atol=1e-4)

    print("KERNEL_OK")
</pallas_src>

<mosaic_0001>
module attributes {stable_mosaic.version = 11 : i64} {
  func.func @chatbot_mlp_kernel(%arg0: i32, %arg1: memref<128x32xbf16, #tpu.memory_space<vmem>>, %arg2: memref<32x128xbf16, #tpu.memory_space<vmem>>, %arg3: memref<1x128xf32, #tpu.memory_space<vmem>>, %arg4: memref<128x16xbf16, #tpu.memory_space<vmem>>, %arg5: memref<1x16xf32, #tpu.memory_space<vmem>>, %arg6: memref<128x16xf32, #tpu.memory_space<vmem>>) attributes {dimension_semantics = [#tpu.dimension_semantics<parallel>], iteration_bounds = array<i64: 2>, scalar_prefetch = 0 : i64, scratch_operands = 0 : i64, tpu.core_type = #tpu.core_type<tc>, window_params = [{transform_indices = @transform_0, window_bounds = array<i64: 128, 32>}, {pipeline_mode = #tpu.pipeline_mode<synchronous>, transform_indices = @transform_1, window_bounds = array<i64: 32, 128>}, {pipeline_mode = #tpu.pipeline_mode<synchronous>, transform_indices = @transform_2, window_bounds = array<i64: 1, 128>}, {pipeline_mode = #tpu.pipeline_mode<synchronous>, transform_indices = @transform_3, window_bounds = array<i64: 128, 16>}, {pipeline_mode = #tpu.pipeline_mode<synchronous>, transform_indices = @transform_4, window_bounds = array<i64: 1, 16>}, {transform_indices = @transform_5, window_bounds = array<i64: 128, 16>}]} {
    %c0 = arith.constant 0 : index
    %c0_0 = arith.constant 0 : index
    %0 = vector.load %arg1[%c0, %c0_0] : memref<128x32xbf16, #tpu.memory_space<vmem>>, vector<128x32xbf16>
    %c0_1 = arith.constant 0 : index
    %c0_2 = arith.constant 0 : index
    %1 = vector.load %arg2[%c0_1, %c0_2] : memref<32x128xbf16, #tpu.memory_space<vmem>>, vector<32x128xbf16>
    %cst = arith.constant dense<0.000000e+00> : vector<128x128xf32>
    %2 = tpu.matmul %0, %1, %cst {dimension_numbers = #tpu.dot_dimension_numbers<[1], [0], [0], [1], [0, 0, 1, 1], [], []>} : vector<128x32xbf16>, vector<32x128xbf16>, vector<128x128xf32> -> vector<128x128xf32>
    %c0_3 = arith.constant 0 : index
    %c0_4 = arith.constant 0 : index
    %3 = vector.load %arg3[%c0_3, %c0_4] : memref<1x128xf32, #tpu.memory_space<vmem>>, vector<1x128xf32>
    %4 = vector.broadcast %3 : vector<1x128xf32> to vector<128x128xf32>
    %5 = arith.addf %2, %4 : vector<128x128xf32>
    %cst_5 = arith.constant 0.000000e+00 : f32
    %6 = vector.broadcast %cst_5 : f32 to vector<128x128xf32>
    %7 = arith.maximumf %5, %6 : vector<128x128xf32>
    %8 = arith.truncf %7 : vector<128x128xf32> to vector<128x128xbf16>
    %c0_6 = arith.constant 0 : index
    %c0_7 = arith.constant 0 : index
    %9 = vector.load %arg4[%c0_6, %c0_7] : memref<128x16xbf16, #tpu.memory_space<vmem>>, vector<128x16xbf16>
    %cst_8 = arith.constant dense<0.000000e+00> : vector<128x16xf32>
    %10 = tpu.matmul %8, %9, %cst_8 {dimension_numbers = #tpu.dot_dimension_numbers<[1], [0], [0], [1], [0, 0, 1, 1], [], []>} : vector<128x128xbf16>, vector<128x16xbf16>, vector<128x16xf32> -> vector<128x16xf32>
    %c0_9 = arith.constant 0 : index
    %c0_10 = arith.constant 0 : index
    %11 = vector.load %arg5[%c0_9, %c0_10] : memref<1x16xf32, #tpu.memory_space<vmem>>, vector<1x16xf32>
    %12 = vector.broadcast %11 : vector<1x16xf32> to vector<128x16xf32>
    %13 = arith.addf %10, %12 : vector<128x16xf32>
    %cst_11 = arith.constant dense<0xFF800000> : vector<128xf32>
    %14 = vector.multi_reduction <maximumf>, %13, %cst_11 [1] : vector<128x16xf32> to vector<128xf32>
    %15 = vector.shape_cast %14 : vector<128xf32> to vector<128x1xf32>
    %16 = vector.broadcast %15 : vector<128x1xf32> to vector<128x16xf32>
    %17 = arith.subf %13, %16 : vector<128x16xf32>
    %18 = math.exp %17 : vector<128x16xf32>
    %cst_12 = arith.constant dense<0.000000e+00> : vector<128xf32>
    %19 = vector.multi_reduction <add>, %18, %cst_12 [1] : vector<128x16xf32> to vector<128xf32>
    %20 = vector.shape_cast %19 : vector<128xf32> to vector<128x1xf32>
    %21 = vector.broadcast %20 : vector<128x1xf32> to vector<128x16xf32>
    %22 = arith.divf %18, %21 : vector<128x16xf32>
    %c0_13 = arith.constant 0 : index
    %c0_14 = arith.constant 0 : index
    %23 = vector.load %arg6[%c0_13, %c0_14] : memref<128x16xf32, #tpu.memory_space<vmem>>, vector<128x16xf32>
    tpu.vector_store %arg6[%c0_13, %c0_14], %22 {strides = array<i32>} : memref<128x16xf32, #tpu.memory_space<vmem>>, vector<128x16xf32>,
    return
  }
  func.func @transform_0(%arg0: i32) -> (i32, i32) {
    %c0_i32 = arith.constant 0 : i32
    %c0_i32_0 = arith.constant 0 : i32
    return %arg0, %c0_i32 : i32, i32
  }
  func.func @transform_1(%arg0: i32) -> (i32, i32) {
    %c0_i32 = arith.constant 0 : i32
    %c0_i32_0 = arith.constant 0 : i32
    %c0_i32_1 = arith.constant 0 : i32
    return %c0_i32, %c0_i32_0 : i32, i32
  }
  func.func @transform_2(%arg0: i32) -> (i32, i32) {
    %c0_i32 = arith.constant 0 : i32
    %c0_i32_0 = arith.constant 0 : i32
    %c0_i32_1 = arith.constant 0 : i32
    return %c0_i32, %c0_i32_0 : i32, i32
  }
  func.func @transform_3(%arg0: i32) -> (i32, i32) {
    %c0_i32 = arith.constant 0 : i32
    %c0_i32_0 = arith.constant 0 : i32
    %c0_i32_1 = arith.constant 0 : i32
    return %c0_i32, %c0_i32_0 : i32, i32
  }
  func.func @transform_4(%arg0: i32) -> (i32, i32) {
    %c0_i32 = arith.constant 0 : i32
    %c0_i32_0 = arith.constant 0 : i32
    %c0_i32_1 = arith.constant 0 : i32
    return %c0_i32, %c0_i32_0 : i32, i32
  }
  func.func @transform_5(%arg0: i32) -> (i32, i32) {
    %c0_i32 = arith.constant 0 : i32
    %c0_i32_0 = arith.constant 0 : i32
    return %arg0, %c0_i32 : i32, i32
  }
}

</mosaic_0001>

<bundles_post_ra>
// kernel: tpu_custom_call.1
= control target key start
LH: loop header
LB: loop body
LE: loop exit
PB: predicated region body
PF: predicated region fallthrough
CT: control target
= control target key end

     0   :  { %s1208_s18 = smov 0   ;;  %s1481_s0 = inlined_call_operand.vmem [shape: bf16[256,32], index: 0, kind: input, shape index: {}]   ;;  %s1482_s1 = inlined_call_operand.vmem [shape: bf16[32,128], index: 1, kind: input, shape index: {}]   ;;  %s1483_s2 = inlined_call_operand.vmem [shape: f32[1,128], index: 2, kind: input, shape index: {}]   ;;  %s1484_s3 = inlined_call_operand.vmem [shape: bf16[128,16], index: 3, kind: input, shape index: {}]   ;;  %s1485_s4 = inlined_call_operand.vmem [shape: f32[1,16], index: 4, kind: input, shape index: {}]   ;;  %s1486_s5 = inlined_call_operand.vmem [shape: f32[256,16], index: 5, kind: output, shape index: {}]  }
   0x1 LB: > { %s977_s19 = sadd.s32 4294967295, %s1176_s18   ;;  %p981_p0 = scmp.ge.s32.totalorder %s1176_s18, 1  ;;  %s1176_s18 = sphi %s1208_s18, %s15_s18  }
   0x2   : > { %p188_p1 = scmp.lt.s32.totalorder %s1176_s18, 3 }
   0x4   : > { %p189_p2 = pnand %p981_p0, %p188_p1 }
   0x5   : > { %s982_s22 = sshll.u32 (!%p189_p2), %s977_s19, 4 }
   0x6   : > { %192 = sbr.rel (%p189_p2) target bundleno = 678 (0x2a6), region = 40  ;;  %p217_p3 = scmp.lt.s32.totalorder (!%p189_p2), %s982_s22, 31 }
   0xb   : > { %v1077_v0 = vld [vmem:[%s1482_s1 + $0x8] sm:$0xff]  ;;  %v1076_v1 = vld [vmem:[%s1482_s1] sm:$0xff]  ;;  %s1488_s22 = smov (!%p217_p3, %s982_s22), 31  ;;  %vm305_vm0 = vcmask 261120   ;;  %v1085_v6 = vld [vmem:[%s1484_s3 + $0x38] sm:$0xff]  ;;  %vm520_vm1 = vcmask 130048  }
   0xc   : > { %336 = vmatpush.bf16.msra.mxu0 %v1077_v0  ;;  %1086 = vmatpush.bf16.msra.mxu3 %v1077_v0  ;;  %s983_s25 = sshll.u32 %s1488_s22, 2  ;;  %v1084_v7 = vld [vmem:[%s1484_s3 + $0x30] sm:$0xff]  ;;  %v1083_v8 = vld [vmem:[%s1484_s3 + $0x28] sm:$0xff]  ;;  %v1082_v10 = vld [vmem:[%s1484_s3 + $0x20] sm:$0xff]  ;;  %s985_s26 = sshll.u32 %s1488_s22, 3 }
   0xd   : > { %s220_s28 = scalar_lea.vmem %s1481_s0, %s983_s25  ;;  %471 = vmatpush.bf16.msra.mxu1 %v1085_v6  ;;  %1088 = vmatpush.bf16.msra.mxu2 %v1085_v6  ;;  %v1081_v14 = vld [vmem:[%s1484_s3 + $0x18] sm:$0xff]  ;;  %v1080_v15 = vld [vmem:[%s1484_s3 + $0x10] sm:$0xff]  ;;  %v1079_v16 = vld [vmem:[%s1484_s3 + $0x8] sm:$0xff]  ;;  %s1428_s29 = scalar_lea.vmem %s1486_s5, %s985_s26 }
   0xe   : > { %v1068_v2 = vld [vmem:[%s220_s28] sm:$0xff]  ;;  %v1069_v3 = vld [vmem:[%s220_s28 + $0x8] sm:$0xff]  ;;  %v1070_v4 = vld [vmem:[%s220_s28 + $0x10] sm:$0xff] }
   0xf   : > { %v1073_v5 = vld [vmem:[%s220_s28 + $0x28] sm:$0xff]  ;;  %v1071_v9 = vld [vmem:[%s220_s28 + $0x18] sm:$0xff]  ;;  %v1074_v11 = vld [vmem:[%s220_s28 + $0x30] sm:$0xff] }
  0x10   : > { %337 = vmatpush.bf16.msra.mxu0 %v1076_v1  ;;  %1087 = vmatpush.bf16.msra.mxu3 %v1076_v1  ;;  %v1072_v12 = vld [vmem:[%s220_s28 + $0x20] sm:$0xff]  ;;  %v1075_v13 = vld [vmem:[%s220_s28 + $0x38] sm:$0xff] }
  0x11   : > { %472 = vmatpush.bf16.msra.mxu1 %v1084_v7  ;;  %1089 = vmatpush.bf16.msra.mxu2 %v1084_v7  ;;  %v1078_v17 = vld [vmem:[%s1484_s3] sm:$0xff] }
  0x12   : > { %v1104_v19 = vld [vmem:[%s1483_s2] ss:$0 sm:$0xff] }
  0x13   : > { %1026 = vmatmul.msk.bf16.vlgmr.msra.gmra.mxu0 %vm305_vm0, %v1068_v2  ;;  %1031 = vmatmul.msk.bf16.vlgmr.msra.gmra.mxu3 %vm305_vm0, %v1073_v5 }
  0x15   : > { %473 = vmatpush.bf16.msra.mxu1 %v1083_v8  ;;  %1090 = vmatpush.bf16.msra.mxu2 %v1083_v8 }
  0x19   : > { %474 = vmatpush.bf16.msra.mxu1 %v1082_v10  ;;  %1091 = vmatpush.bf16.msra.mxu2 %v1082_v10 }
  0x1d   : > { %475 = vmatpush.bf16.msra.mxu1 %v1081_v14  ;;  %1092 = vmatpush.bf16.msra.mxu2 %v1081_v14 }
  0x21   : > { %476 = vmatpush.bf16.msra.mxu1 %v1080_v15  ;;  %1093 = vmatpush.bf16.msra.mxu2 %v1080_v15 }
  0x23   : > { %1027 = vmatmul.msk.bf16.gmra.mxu0 %vm305_vm0, %v1069_v3  ;;  %1032 = vmatmul.msk.bf16.gmra.mxu3 %vm305_vm0, %v1074_v11  ;;  %v1266_v11 = vld [vmem:[%s1485_s4] ss:$0 sm:$0xff] }
  0x25   : > { %477 = vmatpush.bf16.msra.mxu1 %v1079_v16  ;;  %1094 = vmatpush.bf16.msra.mxu2 %v1079_v16 }
  0x29   : > { %478 = vmatpush.bf16.msra.mxu1 %v1078_v17  ;;  %1095 = vmatpush.bf16.msra.mxu2 %v1078_v17 }
  0x33   : > { %1028 = vmatmul.msk.bf16.gmra.mxu0 %vm305_vm0, %v1070_v4  ;;  %1033 = vmatmul.msk.bf16.gmra.mxu3 %vm305_vm0, %v1075_v13 }
  0x43   : > { %1029 = vmatmul.msk.bf16.gmra.mxu0 %vm305_vm0, %v1071_v9 }
  0x53   : > { %1030 = vmatmul.msk.bf16.gmra.mxu0 %vm305_vm0, %v1072_v12 }
  0x90   : > { %v339_v18 = vpop.f32.mrf.mxu0 }
  0x91   : > { %v340_v20 = vadd.f32 %v1104_v19, %v339_v18 }
  0x93   : > { %v379_v23 = vmax.f32 %v340_v20, 0.0 }
  0x96   : > { %v364_v48 = vpop.f32.mrf.mxu3 }
  0x97   : > { %v365_v57 = vadd.f32 %v1104_v19, %v364_v48 }
  0x98   : > { %v341_v21 = vpop.f32.mrf.mxu0 }
  0x99   : > { %v342_v22 = vadd.f32 %v1104_v19, %v341_v21  ;;  %v389_v59 = vmax.f32 %v365_v57, 0.0 }
  0x9b   : > { %v380_v24 = vmax.f32 %v342_v22, 0.0 }
  0x9d   : > { %v395_v25 = vpack.c.bf16 %v380_v24, %v379_v23 }
  0x9e   : > { %v366_v52 = vpop.f32.mrf.mxu3 }
  0x9f   : > { %479 = vmatmul.bf16.vlgmr.msra.gmra.mxu1 %v395_v25  ;;  %v367_v58 = vadd.f32 %v1104_v19, %v366_v52 }
  0xa0   : > { %v344_v26 = vpop.f32.mrf.mxu0 }
  0xa1   : > { %v345_v27 = vadd.f32 %v1104_v19, %v344_v26  ;;  %v390_v60 = vmax.f32 %v367_v58, 0.0 }
  0xa3   : > { %v381_v30 = vmax.f32 %v345_v27, 0.0  ;;  %v400_v61 = vpack.c.bf16 %v390_v60, %v389_v59 }
  0xa6   : > { %v369_v56 = vpop.f32.mrf.mxu3 }
  0xa7   : > { %v370_v63 = vadd.f32 %v1104_v19, %v369_v56 }
  0xa8   : > { %v346_v28 = vpop.f32.mrf.mxu0 }
  0xa9   : > { %v347_v29 = vadd.f32 %v1104_v19, %v346_v28  ;;  %v391_v2 = vmax.f32 %v370_v63, 0.0 }
  0xab   : > { %v382_v31 = vmax.f32 %v347_v29, 0.0 }
  0xad   : > { %v396_v32 = vpack.c.bf16 %v382_v31, %v381_v30 }
  0xae   : > { %v371_v62 = vpop.f32.mrf.mxu3 }
  0xaf   : > { %484 = vmatmul.bf16.gmra.mxu1 %v396_v32  ;;  %v372_v0 = vadd.f32 %v1104_v19, %v371_v62 }
  0xb0   : > { %v349_v33 = vpop.f32.mrf.mxu0 }
  0xb1   : > { %v350_v34 = vadd.f32 %v1104_v19, %v349_v33  ;;  %v392_v3 = vmax.f32 %v372_v0, 0.0 }
  0xb3   : > { %v383_v37 = vmax.f32 %v350_v34, 0.0  ;;  %v401_v4 = vpack.c.bf16 %v392_v3, %v391_v2 }
  0xb6   : > { %v374_v1 = vpop.f32.mrf.mxu3 }
  0xb7   : > { %v375_v6 = vadd.f32 %v1104_v19, %v374_v1 }
  0xb8   : > { %v351_v35 = vpop.f32.mrf.mxu0 }
  0xb9   : > { %v352_v36 = vadd.f32 %v1104_v19, %v351_v35  ;;  %v393_v8 = vmax.f32 %v375_v6, 0.0 }
  0xbb   : > { %v384_v38 = vmax.f32 %v352_v36, 0.0 }
  0xbd   : > { %v397_v39 = vpack.c.bf16 %v384_v38, %v383_v37 }
  0xbe   : > { %v376_v5 = vpop.f32.mrf.mxu3 }
  0xbf   : > { %489 = vmatmul.bf16.gmra.mxu1 %v397_v39  ;;  %v377_v7 = vadd.f32 %v1104_v19, %v376_v5 }
  0xc0   : > { %v354_v40 = vpop.f32.mrf.mxu0 }
  0xc1   : > { %v355_v41 = vadd.f32 %v1104_v19, %v354_v40  ;;  %v394_v9 = vmax.f32 %v377_v7, 0.0 }
  0xc3   : > { %v385_v44 = vmax.f32 %v355_v41, 0.0  ;;  %v402_v10 = vpack.c.bf16 %v394_v9, %v393_v8 }
  0xc8   : > { %v356_v42 = vpop.f32.mrf.mxu0 }
  0xc9   : > { %v357_v43 = vadd.f32 %v1104_v19, %v356_v42 }
  0xcb   : > { %v386_v45 = vmax.f32 %v357_v43, 0.0 }
  0xcd   : > { %v398_v46 = vpack.c.bf16 %v386_v45, %v385_v44 }
  0xcf   : > { %494 = vmatmul.bf16.gmra.mxu1 %v398_v46 }
  0xd0   : > { %v359_v47 = vpop.f32.mrf.mxu0 }
  0xd1   : > { %v360_v49 = vadd.f32 %v1104_v19, %v359_v47 }
  0xd3   : > { %v387_v53 = vmax.f32 %v360_v49, 0.0 }
  0xd8   : > { %v361_v50 = vpop.f32.mrf.mxu0 }
  0xd9   : > { %v362_v51 = vadd.f32 %v1104_v19, %v361_v50 }
  0xdb   : > { %v388_v54 = vmax.f32 %v362_v51, 0.0 }
  0xdd   : > { %v399_v55 = vpack.c.bf16 %v388_v54, %v387_v53 }
  0xdf   : > { %499 = vmatmul.bf16.vlgmr.msra.gmra.mxu2 %v399_v55 }
  0xef   : > { %504 = vmatmul.bf16.gmra.mxu2 %v400_v61 }
  0xff   : > { %509 = vmatmul.bf16.gmra.mxu2 %v401_v4 }
 0x10f   : > { %514 = vmatmul.bf16.gmra.mxu2 %v402_v10 }
 0x11c   : > { %v480_v12 = vpop.f32.mrf.mxu1 }
 0x11d   : > { %v481_v13 = vadd.f32 %v1266_v11, %v480_v12 }
 0x11f   : > { %v521_v14 = vsel %vm520_vm1, %v481_v13, -inf }
 0x120   : > { %522 = vmax.xlane.f32.xlu0 %v521_v14 }
 0x124   : > { %v482_v15 = vpop.f32.mrf.mxu1 }
 0x125   : > { %v1271_v16 = vadd.f32 %v1266_v11, %v482_v15 }
 0x127   : > { %v524_v17 = vsel %vm520_vm1, %v1271_v16, -inf }
 0x128   : > { %525 = vmax.xlane.f32.xlu0 %v524_v17 }
 0x12c   : > { %v485_v18 = vpop.f32.mrf.mxu1 }
 0x12d   : > { %v1276_v19 = vadd.f32 %v1266_v11, %v485_v18 }
 0x12f   : > { %v527_v20 = vsel %vm520_vm1, %v1276_v19, -inf }
 0x130   : > { %528 = vmax.xlane.f32.xlu1 %v527_v20 }
 0x134   : > { %v487_v21 = vpop.f32.mrf.mxu1 }
 0x135   : > { %v1281_v22 = vadd.f32 %v1266_v11, %v487_v21 }
 0x137   : > { %v530_v23 = vsel %vm520_vm1, %v1281_v22, -inf }
 0x138   : > { %531 = vmax.xlane.f32.xlu1 %v530_v23 }
 0x13c   : > { %v490_v24 = vpop.f32.mrf.mxu1 }
 0x13d   : > { %v1286_v25 = vadd.f32 %v1266_v11, %v490_v24 }
 0x13f   : > { %v533_v26 = vsel %vm520_vm1, %v1286_v25, -inf }
 0x140   : > { %534 = vmax.xlane.f32.xlu2 %v533_v26 }
 0x144   : > { %v492_v27 = vpop.f32.mrf.mxu1 }
 0x145   : > { %v1291_v28 = vadd.f32 %v1266_v11, %v492_v27 }
 0x147   : > { %v536_v29 = vsel %vm520_vm1, %v1291_v28, -inf }
 0x148   : > { %537 = vmax.xlane.f32.xlu2 %v536_v29 }
 0x14c   : > { %v495_v30 = vpop.f32.mrf.mxu1 }
 0x14d   : > { %v1296_v31 = vadd.f32 %v1266_v11, %v495_v30 }
 0x14f   : > { %v539_v32 = vsel %vm520_vm1, %v1296_v31, -inf }
 0x150   : > { %540 = vmax.xlane.f32.xlu0 %v539_v32 }
 0x154   : > { %v497_v33 = vpop.f32.mrf.mxu1 }
 0x155   : > { %v1301_v34 = vadd.f32 %v1266_v11, %v497_v33 }
 0x157   : > { %v542_v35 = vsel %vm520_vm1, %v1301_v34, -inf }
 0x158   : > { %543 = vmax.xlane.f32.xlu1 %v542_v35 }
 0x162   : > { %v500_v36 = vpop.f32.mrf.mxu2 }
 0x163   : > { %v1306_v37 = vadd.f32 %v1266_v11, %v500_v36 }
 0x165   : > { %v545_v38 = vsel %vm520_vm1, %v1306_v37, -inf }
 0x166   : > { %546 = vmax.xlane.f32.xlu2 %v545_v38 }
 0x16a   : > { %v502_v39 = vpop.f32.mrf.mxu2 }
 0x16b   : > { %v1311_v40 = vadd.f32 %v1266_v11, %v502_v39 }
 0x16d   : > { %v548_v41 = vsel %vm520_vm1, %v1311_v40, -inf }
 0x16e   : > { %549 = vmax.xlane.f32.xlu0 %v548_v41 }
 0x172   : > { %v505_v42 = vpop.f32.mrf.mxu2 }
 0x173   : > { %v1316_v43 = vadd.f32 %v1266_v11, %v505_v42 }
 0x175   : > { %v551_v44 = vsel %vm520_vm1, %v1316_v43, -inf }
 0x176   : > { %552 = vmax.xlane.f32.xlu1 %v551_v44 }
 0x17a   : > { %v507_v45 = vpop.f32.mrf.mxu2 }
 0x17b   : > { %v1321_v46 = vadd.f32 %v1266_v11, %v507_v45 }
 0x17d   : > { %v554_v47 = vsel %vm520_vm1, %v1321_v46, -inf }
 0x17e   : > { %555 = vmax.xlane.f32.xlu2 %v554_v47 }
 0x182   : > { %v510_v48 = vpop.f32.mrf.mxu2 }
 0x183   : > { %v1326_v49 = vadd.f32 %v1266_v11, %v510_v48 }
 0x185   : > { %v557_v50 = vsel %vm520_vm1, %v1326_v49, -inf }
 0x186   : > { %558 = vmax.xlane.f32.xlu0 %v557_v50 }
 0x18a   : > { %v512_v51 = vpop.f32.mrf.mxu2 }
 0x18b   : > { %v1331_v52 = vadd.f32 %v1266_v11, %v512_v51 }
 0x18d   : > { %v560_v53 = vsel %vm520_vm1, %v1331_v52, -inf }
 0x18e   : > { %561 = vmax.xlane.f32.xlu1 %v560_v53 }
 0x192   : > { %v515_v54 = vpop.f32.mrf.mxu2 }
 0x193   : > { %v1336_v55 = vadd.f32 %v1266_v11, %v515_v54  ;;  %v523_v56 = vpop.xlane.xlu0 %522 }
 0x194   : > { %v569_v57 = vsub.f32 %v481_v13, %v523_v56 }
 0x195   : > { %v563_v58 = vsel %vm520_vm1, %v1336_v55, -inf }
 0x196   : > { %v585_v59 = vmul.f32 1.442695, %v569_v57  ;;  %564 = vmax.xlane.f32.xlu2 %v563_v58 }
 0x198   : > { %1106 = vpow2.f32 %v585_v59 }
 0x19a   : > { %v517_v60 = vpop.f32.mrf.mxu2 }
 0x19b   : > { %v1341_v61 = vadd.f32 %v1266_v11, %v517_v60  ;;  %v526_v62 = vpop.xlane.xlu0 %525 }
 0x19c   : > { %v570_v63 = vsub.f32 %v1271_v16, %v526_v62 }
 0x19d   : > { %v566_v0 = vsel %vm520_vm1, %v1341_v61, -inf }
 0x19e   : > { %v1346_v1 = vpop.eup %1106  ;;  %v587_v2 = vmul.f32 1.442695, %v570_v63  ;;  %567 = vmax.xlane.f32.xlu0 %v566_v0 }
 0x19f   : > { %v617_v3 = vsel %vm520_vm1, %v1346_v1, 0.0 }
 0x1a0   : > { %1108 = vpow2.f32 %v587_v2  ;;  %618 = vadd.xlane.f32.xlu1 %v617_v3 }
 0x1a3   : > { %v529_v4 = vpop.xlane.xlu1 %528 }
 0x1a4   : > { %v571_v5 = vsub.f32 %v1276_v19, %v529_v4 }
 0x1a6   : > { %v1351_v6 = vpop.eup %1108  ;;  %v589_v7 = vmul.f32 1.442695, %v571_v5 }
 0x1a7   : > { %v620_v8 = vsel %vm520_vm1, %v1351_v6, 0.0 }
 0x1a8   : > { %1110 = vpow2.f32 %v589_v7  ;;  %621 = vadd.xlane.f32.xlu2 %v620_v8 }
 0x1ab   : > { %v532_v9 = vpop.xlane.xlu1 %531 }
 0x1ac   : > { %v572_v10 = vsub.f32 %v1281_v22, %v532_v9 }
 0x1ae   : > { %v1356_v11 = vpop.eup %1110  ;;  %v591_v12 = vmul.f32 1.442695, %v572_v10 }
 0x1af   : > { %v623_v13 = vsel %vm520_vm1, %v1356_v11, 0.0 }
 0x1b0   : > { %1112 = vpow2.f32 %v591_v12  ;;  %624 = vadd.xlane.f32.xlu0 %v623_v13 }
 0x1b3   : > { %v535_v14 = vpop.xlane.xlu2 %534 }
 0x1b4   : > { %v573_v15 = vsub.f32 %v1286_v25, %v535_v14 }
 0x1b6   : > { %v1361_v16 = vpop.eup %1112  ;;  %v593_v17 = vmul.f32 1.442695, %v573_v15 }
 0x1b7   : > { %v626_v18 = vsel %vm520_vm1, %v1361_v16, 0.0 }
 0x1b8   : > { %1114 = vpow2.f32 %v593_v17  ;;  %627 = vadd.xlane.f32.xlu1 %v626_v18 }
 0x1bb   : > { %v538_v19 = vpop.xlane.xlu2 %537 }
 0x1bc   : > { %v574_v20 = vsub.f32 %v1291_v28, %v538_v19 }
 0x1be   : > { %v1366_v21 = vpop.eup %1114  ;;  %v595_v22 = vmul.f32 1.442695, %v574_v20 }
 0x1bf   : > { %v629_v23 = vsel %vm520_vm1, %v1366_v21, 0.0 }
 0x1c0   : > { %1116 = vpow2.f32 %v595_v22  ;;  %630 = vadd.xlane.f32.xlu2 %v629_v23 }
 0x1c3   : > { %v541_v24 = vpop.xlane.xlu0 %540 }
 0x1c4   : > { %v575_v25 = vsub.f32 %v1296_v31, %v541_v24 }
 0x1c6   : > { %v1371_v26 = vpop.eup %1116  ;;  %v597_v27 = vmul.f32 1.442695, %v575_v25 }
 0x1c7   : > { %v632_v29 = vsel %vm520_vm1, %v1371_v26, 0.0 }
 0x1c8   : > { %1118 = vpow2.f32 %v597_v27  ;;  %633 = vadd.xlane.f32.xlu0 %v632_v29 }
 0x1cb   : > { %v544_v28 = vpop.xlane.xlu1 %543 }
 0x1cc   : > { %v576_v30 = vsub.f32 %v1301_v34, %v544_v28 }
 0x1ce   : > { %v1376_v32 = vpop.eup %1118  ;;  %v599_v33 = vmul.f32 1.442695, %v576_v30 }
 0x1cf   : > { %v635_v35 = vsel %vm520_vm1, %v1376_v32, 0.0 }
 0x1d0   : > { %1120 = vpow2.f32 %v599_v33  ;;  %636 = vadd.xlane.f32.xlu1 %v635_v35 }
 0x1d6   : > { %v1380_v31 = vpop.eup %1120 }
 0x1d7   : > { %v638_v36 = vsel %vm520_vm1, %v1380_v31, 0.0 }
 0x1d8   : > { %639 = vadd.xlane.f32.xlu2 %v638_v36 }
 0x1d9   : > { %v547_v38 = vpop.xlane.xlu2 %546 }
 0x1da   : > { %v577_v39 = vsub.f32 %v1306_v37, %v547_v38 }
 0x1dc   : > { %v601_v41 = vmul.f32 1.442695, %v577_v39 }
 0x1de   : > { %1122 = vpow2.f32 %v601_v41 }
 0x1e1   : > { %v550_v34 = vpop.xlane.xlu0 %549 }
 0x1e2   : > { %v578_v42 = vsub.f32 %v1311_v40, %v550_v34 }
 0x1e4   : > { %v1386_v44 = vpop.eup %1122  ;;  %v603_v45 = vmul.f32 1.442695, %v578_v42 }
 0x1e5   : > { %v641_v47 = vsel %vm520_vm1, %v1386_v44, 0.0 }
 0x1e6   : > { %1124 = vpow2.f32 %v603_v45  ;;  %642 = vadd.xlane.f32.xlu0 %v641_v47 }
 0x1e9   : > { %v553_v48 = vpop.xlane.xlu1 %552 }
 0x1ea   : > { %v579_v50 = vsub.f32 %v1316_v43, %v553_v48 }
 0x1ec   : > { %v1391_v51 = vpop.eup %1124  ;;  %v605_v53 = vmul.f32 1.442695, %v579_v50 }
 0x1ed   : > { %v644_v37 = vsel %vm520_vm1, %v1391_v51, 0.0 }
 0x1ee   : > { %1126 = vpow2.f32 %v605_v53  ;;  %645 = vadd.xlane.f32.xlu1 %v644_v37 }
 0x1f1   : > { %v556_v40 = vpop.xlane.xlu2 %555 }
 0x1f2   : > { %v580_v54 = vsub.f32 %v1321_v46, %v556_v40 }
 0x1f4   : > { %v1396_v56 = vpop.eup %1126  ;;  %v607_v57 = vmul.f32 1.442695, %v580_v54 }
 0x1f5   : > { %v647_v58 = vsel %vm520_vm1, %v1396_v56, 0.0 }
 0x1f6   : > { %1128 = vpow2.f32 %v607_v57  ;;  %648 = vadd.xlane.f32.xlu2 %v647_v58 }
 0x1f9   : > { %v559_v43 = vpop.xlane.xlu0 %558 }
 0x1fa   : > { %v581_v59 = vsub.f32 %v1326_v49, %v559_v43 }
 0x1fc   : > { %v1401_v60 = vpop.eup %1128  ;;  %v609_v62 = vmul.f32 1.442695, %v581_v59 }
 0x1fd   : > { %v650_v63 = vsel %vm520_vm1, %v1401_v60, 0.0 }
 0x1fe   : > { %1130 = vpow2.f32 %v609_v62  ;;  %651 = vadd.xlane.f32.xlu0 %v650_v63 }
 0x201   : > { %v562_v46 = vpop.xlane.xlu1 %561 }
 0x202   : > { %v582_v0 = vsub.f32 %v1331_v52, %v562_v46 }
 0x204   : > { %v1406_v2 = vpop.eup %1130  ;;  %v611_v3 = vmul.f32 1.442695, %v582_v0 }
 0x205   : > { %v653_v4 = vsel %vm520_vm1, %v1406_v2, 0.0 }
 0x206   : > { %1132 = vpow2.f32 %v611_v3  ;;  %654 = vadd.xlane.f32.xlu1 %v653_v4 }
 0x209   : > { %v565_v49 = vpop.xlane.xlu2 %564 }
 0x20a   : > { %v583_v5 = vsub.f32 %v1336_v55, %v565_v49 }
 0x20c   : > { %v1411_v7 = vpop.eup %1132  ;;  %v613_v8 = vmul.f32 1.442695, %v583_v5 }
 0x20d   : > { %v656_v9 = vsel %vm520_vm1, %v1411_v7, 0.0 }
 0x20e   : > { %1134 = vpow2.f32 %v613_v8  ;;  %657 = vadd.xlane.f32.xlu2 %v656_v9 }
 0x211   : > { %v568_v52 = vpop.xlane.xlu0 %567 }
 0x212   : > { %v584_v10 = vsub.f32 %v1341_v61, %v568_v52 }
 0x213   : > { %v619_v12 = vpop.xlane.xlu1 %618 }
 0x214   : > { %v1416_v13 = vpop.eup %1134  ;;  %v615_v14 = vmul.f32 1.442695, %v584_v10  ;;  %1136 = vrcp.f32 %v619_v12  ;;  %v676_v22 = vand.u32 2147483648, %v619_v12  ;;  %v674_v24 = vand.u32 2147483647, %v619_v12 }
 0x215   : > { %v659_v55 = vsel %vm520_vm1, %v1416_v13, 0.0  ;;  %vm670_vm3 = vweird.f32 %v619_v12 }
 0x216   : > { %1138 = vpow2.f32 %v615_v14  ;;  %660 = vadd.xlane.f32.xlu0 %v659_v55  ;;  %v677_v29 = vor.u32 1.1754944e-38, %v676_v22  ;;  %vm675_vm5 = vcmp.eq.f32.partialorder %v674_v24, 8.507059e+37 }
 0x21a   : > { %v1137_v15 = vpop.eup %1136 }
 0x21b   : > { %v666_v17 = vmul.f32 %v1137_v15, %v619_v12  ;;  %v622_v18 = vpop.xlane.xlu2 %621  ;;  %vm671_vm2 = vweird.f32 %v1137_v15 }
 0x21c   : > { %v1420_v19 = vpop.eup %1138  ;;  %1140 = vrcp.f32 %v622_v18  ;;  %vm672_vm4 = vmor %vm670_vm3, %vm671_vm2  ;;  %v691_v39 = vand.u32 2147483648, %v622_v18  ;;  %v689_v34 = vand.u32 2147483647, %v622_v18  ;;  %vm685_vm7 = vweird.f32 %v622_v18 }
 0x21d   : > { %v667_v20 = vsub.f32 1.0, %v666_v17  ;;  %v662_v61 = vsel %vm520_vm1, %v1420_v19, 0.0 }
 0x21e   : > { %663 = vadd.xlane.f32.xlu1 %v662_v61  ;;  %v692_v47 = vor.u32 1.1754944e-38, %v691_v39  ;;  %vm690_vm9 = vcmp.eq.f32.partialorder %v689_v34, 8.507059e+37 }
 0x21f   : > { %v668_v23 = vmul.f32 %v1137_v15, %v667_v20 }
 0x221   : > { %v669_v25 = vadd.f32 %v1137_v15, %v668_v23 }
 0x222   : > { %v1141_v27 = vpop.eup %1140 }
 0x223   : > { %v673_v28 = vsel %vm672_vm4, %v1137_v15, %v669_v25  ;;  %v681_v30 = vmul.f32 %v1141_v27, %v622_v18  ;;  %v625_v33 = vpop.xlane.xlu0 %624  ;;  %vm686_vm6 = vweird.f32 %v1141_v27 }
 0x224   : > { %v678_v35 = vsel %vm675_vm5, %v677_v29, %v673_v28  ;;  %1142 = vrcp.f32 %v625_v33  ;;  %vm687_vm8 = vmor %vm685_vm7, %vm686_vm6  ;;  %v706_v54 = vand.u32 2147483648, %v625_v33  ;;  %v704_v58 = vand.u32 2147483647, %v625_v33 }
 0x225   : > { %v679_v36 = vmul.f32 %v1346_v1, %v678_v35  ;;  %v682_v38 = vsub.f32 1.0, %v681_v30  ;;  %vm700_vm11 = vweird.f32 %v625_v33 }
 0x226   : > { %v707_v62 = vor.u32 1.1754944e-38, %v706_v54  ;;  %vm705_vm13 = vcmp.eq.f32.partialorder %v704_v58, 8.507059e+37 }
 0x227   : > { %905 = vst.msk [vmem:[%s1428_s29] sm:$0xff] %vm520_vm1, %v679_v36  ;;  %v683_v41 = vmul.f32 %v1141_v27, %v682_v38 }
 0x229   : > { %v684_v42 = vadd.f32 %v1141_v27, %v683_v41 }
 0x22a   : > { %v1143_v45 = vpop.eup %1142 }
 0x22b   : > { %v688_v48 = vsel %vm687_vm8, %v1141_v27, %v684_v42  ;;  %v696_v50 = vmul.f32 %v1143_v45, %v625_v33  ;;  %v628_v53 = vpop.xlane.xlu1 %627  ;;  %vm701_vm10 = vweird.f32 %v1143_v45 }
 0x22c   : > { %v693_v37 = vsel %vm690_vm9, %v692_v47, %v688_v48  ;;  %1144 = vrcp.f32 %v628_v53  ;;  %vm702_vm12 = vmor %vm700_vm11, %vm701_vm10  ;;  %v721_v49 = vand.u32 2147483648, %v628_v53  ;;  %v719_v8 = vand.u32 2147483647, %v628_v53 }
 0x22d   : > { %v694_v1 = vmul.f32 %v1351_v6, %v693_v37  ;;  %v697_v40 = vsub.f32 1.0, %v696_v50  ;;  %vm715_vm15 = vweird.f32 %v628_v53 }
 0x22e   : > { %v722_v10 = vor.u32 1.1754944e-38, %v721_v49  ;;  %vm720_vm2 = vcmp.eq.f32.partialorder %v719_v8, 8.507059e+37 }
 0x22f   : > { %906 = vst.msk [vmem:[%s1428_s29 + $0x8] sm:$0xff] %vm520_vm1, %v694_v1  ;;  %v698_v57 = vmul.f32 %v1143_v45, %v697_v40 }
 0x231   : > { %v699_v43 = vadd.f32 %v1143_v45, %v698_v57 }
 0x232   : > { %v1145_v59 = vpop.eup %1144 }
 0x233   : > { %v703_v63 = vsel %vm702_vm12, %v1143_v45, %v699_v43  ;;  %v711_v46 = vmul.f32 %v1145_v59, %v628_v53  ;;  %v631_v0 = vpop.xlane.xlu2 %630  ;;  %vm716_vm14 = vweird.f32 %v1145_v59 }
 0x234   : > { %v708_v3 = vsel %vm705_vm13, %v707_v62, %v703_v63  ;;  %1146 = vrcp.f32 %v631_v0  ;;  %vm717_vm0 = vmor %vm715_vm15, %vm716_vm14  ;;  %v736_v18 = vand.u32 2147483648, %v631_v0  ;;  %v734_v61 = vand.u32 2147483647, %v631_v0 }
 0x235   : > { %v709_v6 = vmul.f32 %v1356_v11, %v708_v3  ;;  %v712_v4 = vsub.f32 1.0, %v711_v46  ;;  %vm730_vm4 = vweird.f32 %v631_v0 }
 0x236   : > { %v737_v24 = vor.u32 1.1754944e-38, %v736_v18  ;;  %vm735_vm6 = vcmp.eq.f32.partialorder %v734_v61, 8.507059e+37 }
 0x237   : > { %907 = vst.msk [vmem:[%s1428_s29 + $0x10] sm:$0xff] %vm520_vm1, %v709_v6  ;;  %v713_v5 = vmul.f32 %v1145_v59, %v712_v4 }
 0x239   : > { %v714_v9 = vadd.f32 %v1145_v59, %v713_v5 }
 0x23a   : > { %v1147_v52 = vpop.eup %1146 }
 0x23b   : > { %v718_v12 = vsel %vm717_vm0, %v1145_v59, %v714_v9  ;;  %v726_v14 = vmul.f32 %v1147_v52, %v631_v0  ;;  %v634_v55 = vpop.xlane.xlu0 %633  ;;  %vm731_vm3 = vweird.f32 %v1147_v52 }
 0x23c   : > { %v723_v15 = vsel %vm720_vm2, %v722_v10, %v718_v12  ;;  %1148 = vrcp.f32 %v634_v55  ;;  %vm732_vm5 = vmor %vm730_vm4, %vm731_vm3  ;;  %v751_v33 = vand.u32 2147483648, %v634_v55  ;;  %v749_v36 = vand.u32 2147483647, %v634_v55 }
 0x23d   : > { %v724_v11 = vmul.f32 %v1361_v16, %v723_v15  ;;  %v727_v17 = vsub.f32 1.0, %v726_v14  ;;  %vm745_vm8 = vweird.f32 %v634_v55 }
 0x23e   : > { %v752_v41 = vor.u32 1.1754944e-38, %v751_v33  ;;  %vm750_vm10 = vcmp.eq.f32.partialorder %v749_v36, 8.507059e+37 }
 0x23f   : > { %908 = vst.msk [vmem:[%s1428_s29 + $0x18] sm:$0xff] %vm520_vm1, %v724_v11  ;;  %v728_v20 = vmul.f32 %v1147_v52, %v727_v17 }
 0x241   : > { %v729_v22 = vadd.f32 %v1147_v52, %v728_v20 }
 0x242   : > { %v1149_v23 = vpop.eup %1148 }
 0x243   : > { %v733_v25 = vsel %vm732_vm5, %v1147_v52, %v729_v22  ;;  %v741_v27 = vmul.f32 %v1149_v23, %v634_v55  ;;  %v637_v29 = vpop.xlane.xlu1 %636  ;;  %vm746_vm7 = vweird.f32 %v1149_v23 }
 0x244   : > { %v738_v28 = vsel %vm735_vm6, %v737_v24, %v733_v25  ;;  %1150 = vrcp.f32 %v637_v29  ;;  %vm747_vm9 = vmor %vm745_vm8, %vm746_vm7  ;;  %v766_v50 = vand.u32 2147483648, %v637_v29  ;;  %v764_v37 = vand.u32 2147483647, %v637_v29 }
 0x245   : > { %v739_v16 = vmul.f32 %v1366_v21, %v738_v28  ;;  %v742_v30 = vsub.f32 1.0, %v741_v27  ;;  %vm760_vm12 = vweird.f32 %v637_v29 }
 0x246   : > { %v767_v54 = vor.u32 1.1754944e-38, %v766_v50  ;;  %vm765_vm14 = vcmp.eq.f32.partialorder %v764_v37, 8.507059e+37 }
 0x247   : > { %909 = vst.msk [vmem:[%s1428_s29 + $0x20] sm:$0xff] %vm520_vm1, %v739_v16  ;;  %v743_v35 = vmul.f32 %v1149_v23, %v742_v30 }
 0x249   : > { %v744_v38 = vadd.f32 %v1149_v23, %v743_v35 }
 0x24a   : > { %v1151_v39 = vpop.eup %1150 }
 0x24b   : > { %v748_v34 = vsel %vm747_vm9, %v1149_v23, %v744_v38  ;;  %v756_v42 = vmul.f32 %v1151_v39, %v637_v29  ;;  %v640_v45 = vpop.xlane.xlu2 %639  ;;  %vm761_vm11 = vweird.f32 %v1151_v39 }
 0x24c   : > { %v753_v47 = vsel %vm750_vm10, %v752_v41, %v748_v34  ;;  %1152 = vrcp.f32 %v640_v45  ;;  %vm762_vm13 = vmor %vm760_vm12, %vm761_vm11  ;;  %v781_v62 = vand.u32 2147483648, %v640_v45  ;;  %v779_v46 = vand.u32 2147483647, %v640_v45 }
 0x24d   : > { %v754_v21 = vmul.f32 %v1371_v26, %v753_v47  ;;  %v757_v48 = vsub.f32 1.0, %v756_v42  ;;  %vm775_vm0 = vweird.f32 %v640_v45 }
 0x24e   : > { %v782_v6 = vor.u32 1.1754944e-38, %v781_v62  ;;  %vm780_vm3 = vcmp.eq.f32.partialorder %v779_v46, 8.507059e+37 }
 0x24f   : > { %910 = vst.msk [vmem:[%s1428_s29 + $0x28] sm:$0xff] %vm520_vm1, %v754_v21  ;;  %v758_v53 = vmul.f32 %v1151_v39, %v757_v48 }
 0x251   : > { %v759_v1 = vadd.f32 %v1151_v39, %v758_v53 }
 0x252   : > { %v1153_v40 = vpop.eup %1152 }
 0x253   : > { %v763_v57 = vsel %vm762_vm13, %v1151_v39, %v759_v1  ;;  %v771_v58 = vmul.f32 %v1153_v40, %v640_v45  ;;  %vm776_vm15 = vweird.f32 %v1153_v40 }
 0x254   : > { %v768_v43 = vsel %vm765_vm14, %v767_v54, %v763_v57  ;;  %vm777_vm2 = vmor %vm775_vm0, %vm776_vm15 }
 0x255   : > { %v769_v59 = vmul.f32 %v1376_v32, %v768_v43  ;;  %v772_v26 = vsub.f32 1.0, %v771_v58 }
 0x257   : > { %911 = vst.msk [vmem:[%s1428_s29 + $0x30] sm:$0xff] %vm520_vm1, %v769_v59  ;;  %v773_v63 = vmul.f32 %v1153_v40, %v772_v26 }
 0x259   : > { %v774_v0 = vadd.f32 %v1153_v40, %v773_v63  ;;  %v643_v3 = vpop.xlane.xlu0 %642 }
 0x25a   : > { %1154 = vrcp.f32 %v643_v3  ;;  %v796_v10 = vand.u32 2147483648, %v643_v3  ;;  %v794_v14 = vand.u32 2147483647, %v643_v3  ;;  %vm790_vm5 = vweird.f32 %v643_v3 }
 0x25b   : > { %v778_v4 = vsel %vm777_vm2, %v1153_v40, %v774_v0 }
 0x25c   : > { %v783_v49 = vsel %vm780_vm3, %v782_v6, %v778_v4  ;;  %v797_v11 = vor.u32 1.1754944e-38, %v796_v10  ;;  %vm795_vm7 = vcmp.eq.f32.partialorder %v794_v14, 8.507059e+37 }
 0x25d   : > { %v784_v5 = vmul.f32 %v1380_v31, %v783_v49 }
 0x25f   : > { %912 = vst.msk [vmem:[%s1428_s29 + $0x38] sm:$0xff] %vm520_vm1, %v784_v5 }
 0x260   : > { %v1155_v32 = vpop.eup %1154 }
 0x261   : > { %v786_v8 = vmul.f32 %v1155_v32, %v643_v3  ;;  %v646_v9 = vpop.xlane.xlu1 %645  ;;  %vm791_vm4 = vweird.f32 %v1155_v32 }
 0x262   : > { %1156 = vrcp.f32 %v646_v9  ;;  %vm792_vm6 = vmor %vm790_vm5, %vm791_vm4  ;;  %v811_v23 = vand.u32 2147483648, %v646_v9  ;;  %v809_v25 = vand.u32 2147483647, %v646_v9  ;;  %vm805_vm9 = vweird.f32 %v646_v9 }
 0x263   : > { %v787_v52 = vsub.f32 1.0, %v786_v8 }
 0x264   : > { %v812_v28 = vor.u32 1.1754944e-38, %v811_v23  ;;  %vm810_vm11 = vcmp.eq.f32.partialorder %v809_v25, 8.507059e+37 }
 0x265   : > { %v788_v12 = vmul.f32 %v1155_v32, %v787_v52 }
 0x267   : > { %v789_v55 = vadd.f32 %v1155_v32, %v788_v12 }
 0x268   : > { %v1157_v15 = vpop.eup %1156 }
 0x269   : > { %v793_v17 = vsel %vm792_vm6, %v1155_v32, %v789_v55  ;;  %v801_v31 = vmul.f32 %v1157_v15, %v646_v9  ;;  %v649_v18 = vpop.xlane.xlu2 %648  ;;  %vm806_vm8 = vweird.f32 %v1157_v15 }
 0x26a   : > { %v798_v20 = vsel %vm795_vm7, %v797_v11, %v793_v17  ;;  %1158 = vrcp.f32 %v649_v18  ;;  %vm807_vm10 = vmor %vm805_vm9, %vm806_vm8  ;;  %v826_v38 = vand.u32 2147483648, %v649_v18  ;;  %v824_v41 = vand.u32 2147483647, %v649_v18 }
 0x26b   : > { %v799_v61 = vmul.f32 %v1386_v44, %v798_v20  ;;  %v802_v22 = vsub.f32 1.0, %v801_v31  ;;  %vm820_vm13 = vweird.f32 %v649_v18 }
 0x26c   : > { %v827_v45 = vor.u32 1.1754944e-38, %v826_v38  ;;  %vm825_vm15 = vcmp.eq.f32.partialorder %v824_v41, 8.507059e+37 }
 0x26d   : > { %913 = vst.msk [vmem:[%s1428_s29 + $0x40] sm:$0xff] %vm520_vm1, %v799_v61  ;;  %v803_v24 = vmul.f32 %v1157_v15, %v802_v22 }
 0x26f   : > { %v804_v27 = vadd.f32 %v1157_v15, %v803_v24 }
 0x270   : > { %v1159_v29 = vpop.eup %1158 }
 0x271   : > { %v808_v16 = vsel %vm807_vm10, %v1157_v15, %v804_v27  ;;  %v816_v30 = vmul.f32 %v1159_v29, %v649_v18  ;;  %v652_v33 = vpop.xlane.xlu0 %651  ;;  %vm821_vm12 = vweird.f32 %v1159_v29 }
 0x272   : > { %v813_v35 = vsel %vm810_vm11, %v812_v28, %v808_v16  ;;  %1160 = vrcp.f32 %v652_v33  ;;  %vm822_vm14 = vmor %vm820_vm13, %vm821_vm12  ;;  %v841_v37 = vand.u32 2147483648, %v652_v33  ;;  %v839_v40 = vand.u32 2147483647, %v652_v33 }
 0x273   : > { %v814_v44 = vmul.f32 %v1391_v51, %v813_v35  ;;  %v817_v36 = vsub.f32 1.0, %v816_v30  ;;  %vm835_vm2 = vweird.f32 %v652_v33 }
 0x274   : > { %v842_v58 = vor.u32 1.1754944e-38, %v841_v37  ;;  %vm840_vm4 = vcmp.eq.f32.partialorder %v839_v40, 8.507059e+37 }
 0x275   : > { %914 = vst.msk [vmem:[%s1428_s29 + $0x48] sm:$0xff] %vm520_vm1, %v814_v44  ;;  %v818_v39 = vmul.f32 %v1159_v29, %v817_v36 }
 0x277   : > { %v819_v34 = vadd.f32 %v1159_v29, %v818_v39 }
 0x278   : > { %v1161_v42 = vpop.eup %1160 }
 0x279   : > { %v823_v47 = vsel %vm822_vm14, %v1159_v29, %v819_v34  ;;  %v831_v21 = vmul.f32 %v1161_v42, %v652_v33  ;;  %v655_v48 = vpop.xlane.xlu1 %654  ;;  %vm836_vm0 = vweird.f32 %v1161_v42 }
 0x27a   : > { %v828_v50 = vsel %vm825_vm15, %v827_v45, %v823_v47  ;;  %1162 = vrcp.f32 %v655_v48  ;;  %vm837_vm3 = vmor %vm835_vm2, %vm836_vm0  ;;  %v856_v46 = vand.u32 2147483648, %v655_v48  ;;  %v854_v3 = vand.u32 2147483647, %v655_v48 }
 0x27b   : > { %v829_v51 = vmul.f32 %v1396_v56, %v828_v50  ;;  %v832_v53 = vsub.f32 1.0, %v831_v21  ;;  %vm850_vm6 = vweird.f32 %v655_v48 }
 0x27c   : > { %v857_v49 = vor.u32 1.1754944e-38, %v856_v46  ;;  %vm855_vm8 = vcmp.eq.f32.partialorder %v854_v3, 8.507059e+37 }
 0x27d   : > { %915 = vst.msk [vmem:[%s1428_s29 + $0x50] sm:$0xff] %vm520_vm1, %v829_v51  ;;  %v833_v1 = vmul.f32 %v1161_v42, %v832_v53 }
 0x27f   : > { %v834_v54 = vadd.f32 %v1161_v42, %v833_v1 }
 0x280   : > { %v1163_v57 = vpop.eup %1162 }
 0x281   : > { %v838_v43 = vsel %vm837_vm3, %v1161_v42, %v834_v54  ;;  %v846_v59 = vmul.f32 %v1163_v57, %v655_v48  ;;  %v658_v26 = vpop.xlane.xlu2 %657  ;;  %vm851_vm5 = vweird.f32 %v1163_v57 }
 0x282   : > { %v843_v62 = vsel %vm840_vm4, %v842_v58, %v838_v43  ;;  %1164 = vrcp.f32 %v658_v26  ;;  %vm852_vm7 = vmor %vm850_vm6, %vm851_vm5  ;;  %v871_v10 = vand.u32 2147483648, %v658_v26  ;;  %v869_v14 = vand.u32 2147483647, %v658_v26 }
 0x283   : > { %v844_v56 = vmul.f32 %v1401_v60, %v843_v62  ;;  %v847_v63 = vsub.f32 1.0, %v846_v59  ;;  %vm865_vm10 = vweird.f32 %v658_v26 }
 0x284   : > { %v872_v11 = vor.u32 1.1754944e-38, %v871_v10  ;;  %vm870_vm12 = vcmp.eq.f32.partialorder %v869_v14, 8.507059e+37 }
 0x285   : > { %916 = vst.msk [vmem:[%s1428_s29 + $0x58] sm:$0xff] %vm520_vm1, %v844_v56  ;;  %v848_v0 = vmul.f32 %v1163_v57, %v847_v63 }
 0x287   : > { %v849_v6 = vadd.f32 %v1163_v57, %v848_v0 }
 0x288   : > { %v1165_v4 = vpop.eup %1164 }
 0x289   : > { %v853_v5 = vsel %vm852_vm7, %v1163_v57, %v849_v6  ;;  %v861_v32 = vmul.f32 %v1165_v4, %v658_v26  ;;  %v661_v8 = vpop.xlane.xlu0 %660  ;;  %vm866_vm9 = vweird.f32 %v1165_v4 }
 0x28a   : > { %v858_v9 = vsel %vm855_vm8, %v857_v49, %v853_v5  ;;  %1166 = vrcp.f32 %v661_v8  ;;  %vm867_vm11 = vmor %vm865_vm10, %vm866_vm9  ;;  %v886_v22 = vand.u32 2147483648, %v661_v8  ;;  %v884_v24 = vand.u32 2147483647, %v661_v8 }
 0x28b   : > { %v859_v60 = vmul.f32 %v1406_v2, %v858_v9  ;;  %v862_v52 = vsub.f32 1.0, %v861_v32  ;;  %vm880_vm14 = vweird.f32 %v661_v8 }
 0x28c   : > { %v887_v29 = vor.u32 1.1754944e-38, %v886_v22  ;;  %vm885_vm0 = vcmp.eq.f32.partialorder %v884_v24, 8.507059e+37 }
 0x28d   : > { %917 = vst.msk [vmem:[%s1428_s29 + $0x60] sm:$0xff] %vm520_vm1, %v859_v60  ;;  %v863_v12 = vmul.f32 %v1165_v4, %v862_v52 }
 0x28f   : > { %v864_v55 = vadd.f32 %v1165_v4, %v863_v12 }
 0x290   : > { %v1167_v15 = vpop.eup %1166 }
 0x291   : > { %v868_v17 = vsel %vm867_vm11, %v1165_v4, %v864_v55  ;;  %v876_v31 = vmul.f32 %v1167_v15, %v661_v8  ;;  %v664_v18 = vpop.xlane.xlu1 %663  ;;  %vm881_vm13 = vweird.f32 %v1167_v15 }
 0x292   : > { %v873_v20 = vsel %vm870_vm12, %v872_v11, %v868_v17  ;;  %1168 = vrcp.f32 %v664_v18  ;;  %vm882_vm15 = vmor %vm880_vm14, %vm881_vm13  ;;  %v901_v35 = vand.u32 2147483648, %v664_v18  ;;  %v899_v36 = vand.u32 2147483647, %v664_v18 }
 0x293   : > { %v874_v2 = vmul.f32 %v1411_v7, %v873_v20  ;;  %v877_v61 = vsub.f32 1.0, %v876_v31  ;;  %vm895_vm3 = vweird.f32 %v664_v18 }
 0x294   : > { %v902_v39 = vor.u32 1.1754944e-38, %v901_v35  ;;  %vm900_vm5 = vcmp.eq.f32.partialorder %v899_v36, 8.507059e+37 }
 0x295   : > { %918 = vst.msk [vmem:[%s1428_s29 + $0x68] sm:$0xff] %vm520_vm1, %v874_v2  ;;  %v878_v23 = vmul.f32 %v1167_v15, %v877_v61 }
 0x297   : > { %v879_v25 = vadd.f32 %v1167_v15, %v878_v23 }
 0x298   : > { %v1169_v27 = vpop.eup %1168 }
 0x299   : > { %v883_v28 = vsel %vm882_vm15, %v1167_v15, %v879_v25  ;;  %v891_v16 = vmul.f32 %v1169_v27, %v664_v18  ;;  %vm896_vm2 = vweird.f32 %v1169_v27 }
 0x29a   : > { %v888_v30 = vsel %vm885_vm0, %v887_v29, %v883_v28  ;;  %vm897_vm4 = vmor %vm895_vm3, %vm896_vm2 }
 0x29b   : > { %v889_v7 = vmul.f32 %v1416_v13, %v888_v30  ;;  %v892_v33 = vsub.f32 1.0, %v891_v16 }
 0x29d   : > { %919 = vst.msk [vmem:[%s1428_s29 + $0x70] sm:$0xff] %vm520_vm1, %v889_v7  ;;  %v893_v44 = vmul.f32 %v1169_v27, %v892_v33 }
 0x29f   : > { %v894_v38 = vadd.f32 %v1169_v27, %v893_v44 }
 0x2a1   : > { %v898_v41 = vsel %vm897_vm4, %v1169_v27, %v894_v38 }
 0x2a2   : > { %v903_v34 = vsel %vm900_vm5, %v902_v39, %v898_v41 }
 0x2a3   : > { %v904_v42 = vmul.f32 %v1420_v19, %v903_v34 }
 0x2a5   : > { %920 = vst.msk [vmem:[%s1428_s29 + $0x78] sm:$0xff] %vm520_vm1, %v904_v42 }
 0x2a6 PF: > { %s15_s18 = sadd.s32 1, %s1176_s18  }
 0x2a7   : > { %p12_p4 = scmp.ge.s32.totalorder %s15_s18, 4  }
 0x2a9   :  { %14 = sbr.rel (!%p12_p4) target bundleno = 1 (0x1), region = 70 }

</bundles_post_ra>
